<compile_context>
chip_gen: v7x
topology: tpu7x:2x2x1
jax: 0.10.0
libtpu: 0.0.40
codegen_flags: <defaults>
</compile_context>

<pallas_src>
import jax
import jax.numpy as jnp
from jax.experimental import pallas as pl
from jax.experimental.pallas import tpu as pltpu

LANE = 128  # lane-padded width for feature / hidden / class dims


def classifier_kernel(x_ref, wg_ref, bg_ref, w1_ref, b1_ref, w2_ref, b2_ref, o_ref):
    """Fused encoder + MLP head + log-softmax on one batch tile.

    x_ref : (TB, D_in)    bf16 flattened last-window input tile
    wg_ref: (D_in, 128)   bf16 g_enc linear weight (lane-padded with zeros)
    bg_ref: (1, 128)      f32
    w1_ref: (128, 128)    bf16 hidden Linear (lane-padded with zeros)
    b1_ref: (1, 128)      f32
    w2_ref: (128, 128)    bf16 output Linear (lane-padded with zeros)
    b2_ref: (1, 128)      f32  (padded class lanes hold -1e30 => mask is free)
    o_ref : (TB, 128)     log-probabilities (padded class lanes ~ -1e30)
    """
    x = x_ref[...]

    # g_enc: Linear + ReLU  (bf16 MXU operands, f32 accumulation / elementwise)
    z = jnp.dot(x, wg_ref[...], preferred_element_type=jnp.float32) + bg_ref[...]
    z = jnp.maximum(z, 0.0)

    # hidden layer: Linear + ReLU (+ Dropout as identity, eval mode)
    # TODO(synk): on v6e/v7x the bias-add/ReLU could stay bf16 (bf16 VALU); kept
    # f32 here for v5e portability.
    h = jnp.dot(z.astype(w1_ref.dtype), w1_ref[...],
                preferred_element_type=jnp.float32) + b1_ref[...]
    h = jnp.maximum(h, 0.0)

    # output layer; padded class lanes get logits = 0*h + (-1e30) via the bias,
    # so no explicit masking is needed before the log-softmax.
    logits = jnp.dot(h.astype(w2_ref.dtype), w2_ref[...],
                     preferred_element_type=jnp.float32) + b2_ref[...]

    # LogSoftmax(dim=-1), numerically stable, f32.
    m = jnp.max(logits, axis=-1, keepdims=True)
    shifted = logits - m
    lse = jnp.log(jnp.sum(jnp.exp(shifted), axis=-1, keepdims=True))
    o_ref[...] = (shifted - lse).astype(o_ref.dtype)


def _batch_dim_semantics():
    """Shard the batch grid axis across TensorCores on v7x; plain parallel otherwise."""
    try:
        kind = jax.devices()[0].device_kind.lower()
        if "v7" in kind:
            return (pltpu.CORE_PARALLEL,)
    except Exception:
        pass
    return ("parallel",)


def classifier_forward(X, params, out_dtype=jnp.float32):
    """X: (N, C, T, W) float32.

    Returns (N, 128) log-probabilities with padded class lanes ~ -1e30 (i.e.
    probability 0). The consumer slices `[:, :num_classes]` if it needs the
    logical width — done lazily so the kernel output isn't re-copied through HBM.
    """
    wg, bg, w1, b1, w2, b2 = params
    N = X.shape[0]
    d_in = wg.shape[0]
    cpad = w2.shape[1]  # lane-padded class width (128)

    # Last window + flatten; cast matmul operand to bf16 (f32 accumulation in-kernel).
    x_flat = X[..., -1].reshape(N, d_in).astype(jnp.bfloat16)

    # Large batch tile (amortizes the ~0.35 us/step pipeline overhead); no
    # wrapper-side padding — Pallas masks the partial boundary tile.
    tb = N if N <= 1024 else 1024
    grid = (pl.cdiv(N, tb),)

    def weight_spec(shape):
        return pl.BlockSpec(shape, lambda i: (0, 0))

    out_itemsize = jnp.dtype(out_dtype).itemsize
    flops = 2 * N * (d_in * cpad + cpad * cpad + cpad * cpad)
    bytes_accessed = (
        N * d_in * 2                            # bf16 activations in
        + (wg.size + w1.size + w2.size) * 2     # bf16 weights
        + (bg.size + b1.size + b2.size) * 4     # f32 biases
        + N * cpad * out_itemsize               # output
    )
    cost = pl.CostEstimate(
        flops=int(flops),
        transcendentals=int(N * (cpad + 1)),    # exp per lane + log per row
        bytes_accessed=int(bytes_accessed),
    )

    # VMEM budget: double-buffered activation + output tiles, weights (counted
    # double-buffered to be safe), plus headroom. Kept well under v7x's 64 MiB.
    x_tile_b = tb * d_in * 2
    o_tile_b = tb * cpad * out_itemsize
    w_bytes = (wg.size + w1.size + w2.size) * 2 + (bg.size + b1.size + b2.size) * 4
    vmem_limit = int(min(48 << 20, 2 * (x_tile_b + o_tile_b + w_bytes) + (8 << 20)))

    out = pl.pallas_call(
        classifier_kernel,
        out_shape=jax.ShapeDtypeStruct((N, cpad), out_dtype),
        grid=grid,
        in_specs=[
            pl.BlockSpec((tb, d_in), lambda i: (i, 0)),    # batch-tiled activations
            weight_spec(wg.shape), weight_spec(bg.shape),  # VMEM-resident weights
            weight_spec(w1.shape), weight_spec(b1.shape),
            weight_spec(w2.shape), weight_spec(b2.shape),
        ],
        out_specs=pl.BlockSpec((tb, cpad), lambda i: (i, 0)),
        compiler_params=pltpu.CompilerParams(
            dimension_semantics=_batch_dim_semantics(),
            vmem_limit_bytes=vmem_limit,
            # allow XLA to fuse the slice/reshape/cast producing x_flat into the
            # kernel's input DMA (removes a separate HBM->HBM pass at scale).
            allow_input_fusion=(True, False, False, False, False, False, False),
        ),
        cost_estimate=cost,
    )(x_flat, wg, bg, w1, b1, w2, b2)

    return out


def init_params(key, d_in, feat, hidden, num_classes):
    """PyTorch-style uniform(-1/sqrt(fan_in), 1/sqrt(fan_in)) init, lane-padded to 128.

    Weights are stored (in_features, out_features) in bf16 (MXU operands); biases
    stay f32. Zero padding keeps the logical math identical; the OUTPUT bias is
    padded with -1e30 so the class-lane mask is baked in (padded w2 cols are 0).
    """
    ks = jax.random.split(key, 6)

    def lin(kw, kb, fan_in, fan_out, rows, cols, bias_pad=0.0):
        bound = fan_in ** -0.5
        w = jax.random.uniform(kw, (fan_in, fan_out), jnp.float32, -bound, bound)
        b = jax.random.uniform(kb, (1, fan_out), jnp.float32, -bound, bound)
        w = jnp.pad(w, ((0, rows - fan_in), (0, cols - fan_out)))
        b = jnp.pad(b, ((0, 0), (0, cols - fan_out)), constant_values=bias_pad)
        return w.astype(jnp.bfloat16), b

    wg, bg = lin(ks[0], ks[1], d_in, feat, d_in, LANE)             # g_enc linear
    w1, b1 = lin(ks[2], ks[3], feat, hidden, LANE, LANE)           # hidden layer
    w2, b2 = lin(ks[4], ks[5], hidden, num_classes, LANE, LANE,
                 bias_pad=-1e30)                                   # output layer (mask baked in)
    return wg, bg, w1, b1, w2, b2


def reference_forward(X, params, num_classes):
    """Pure-JAX f32 reference using the same (padded) parameters."""
    wg, bg, w1, b1, w2, b2 = params
    x = X[..., -1].reshape(X.shape[0], -1).astype(jnp.float32)
    z = jnp.maximum(x @ wg.astype(jnp.float32) + bg, 0.0)
    h = jnp.maximum(z @ w1.astype(jnp.float32) + b1, 0.0)
    logits = (h @ w2.astype(jnp.float32) + b2)[:, :num_classes]
    return jax.nn.log_softmax(logits, axis=-1)


if __name__ == "__main__":
    key = jax.random.PRNGKey(0)
    k_x, k_p = jax.random.split(key)

    # small shapes consistent with the module's forward
    N, C, T, W = 8, 4, 16, 8      # X: (batch, channels, seq, windows)
    feat = 32                     # g_enc.output_shape()[1]
    hidden = 32                   # hiddens=[32]
    num_classes = 10

    X = jax.random.normal(k_x, (N, C, T, W), dtype=jnp.float32)
    params = init_params(k_p, C * T, feat, hidden, num_classes)

    fwd = jax.jit(classifier_forward)
    y_full = jax.block_until_ready(fwd(X, params))   # (N, 128) padded log-probs

    assert y_full.shape == (N, LANE)

    # rows of exp(log-probs) sum to 1 even over the padded lanes (verifies the
    # baked-in -1e30 bias mask keeps padded classes at probability 0)
    row_sums = jnp.sum(jnp.exp(y_full.astype(jnp.float32)), axis=-1)
    assert bool(jnp.allclose(row_sums, 1.0, atol=1e-4))

    # consumer-side slice to the logical class width (kept out of the kernel path)
    y_pred = y_full[:, :num_classes]
    assert y_pred.shape == (N, num_classes)

    # matches pure-JAX f32 reference up to bf16 matmul-operand rounding
    y_ref = reference_forward(X, params, num_classes)
    assert bool(jnp.max(jnp.abs(y_pred.astype(jnp.float32) - y_ref)) < 0.1)

    print("KERNEL_OK")
</pallas_src>

<mosaic_0001>
module attributes {stable_mosaic.version = 11 : i64} {
  func.func @classifier_kernel(%arg0: i32, %arg1: memref<8x64xbf16, #tpu.memory_space<vmem>>, %arg2: memref<64x128xbf16, #tpu.memory_space<vmem>>, %arg3: memref<1x128xf32, #tpu.memory_space<vmem>>, %arg4: memref<128x128xbf16, #tpu.memory_space<vmem>>, %arg5: memref<1x128xf32, #tpu.memory_space<vmem>>, %arg6: memref<128x128xbf16, #tpu.memory_space<vmem>>, %arg7: memref<1x128xf32, #tpu.memory_space<vmem>>, %arg8: memref<8x128xf32, #tpu.memory_space<vmem>>) attributes {dimension_semantics = [#tpu.dimension_semantics<parallel>], iteration_bounds = array<i64: 1>, scalar_prefetch = 0 : i64, scratch_operands = 0 : i64, tpu.core_type = #tpu.core_type<tc>, window_params = [{transform_indices = @transform_0, window_bounds = array<i64: 8, 64>}, {pipeline_mode = #tpu.pipeline_mode<synchronous>, transform_indices = @transform_1, window_bounds = array<i64: 64, 128>}, {pipeline_mode = #tpu.pipeline_mode<synchronous>, transform_indices = @transform_2, window_bounds = array<i64: 1, 128>}, {pipeline_mode = #tpu.pipeline_mode<synchronous>, transform_indices = @transform_3, window_bounds = array<i64: 128, 128>}, {pipeline_mode = #tpu.pipeline_mode<synchronous>, transform_indices = @transform_4, window_bounds = array<i64: 1, 128>}, {pipeline_mode = #tpu.pipeline_mode<synchronous>, transform_indices = @transform_5, window_bounds = array<i64: 128, 128>}, {pipeline_mode = #tpu.pipeline_mode<synchronous>, transform_indices = @transform_6, window_bounds = array<i64: 1, 128>}, {transform_indices = @transform_7, window_bounds = array<i64: 8, 128>}]} {
    %c0 = arith.constant 0 : index
    %c0_0 = arith.constant 0 : index
    %0 = vector.load %arg1[%c0, %c0_0] : memref<8x64xbf16, #tpu.memory_space<vmem>>, vector<8x64xbf16>
    %c0_1 = arith.constant 0 : index
    %c0_2 = arith.constant 0 : index
    %1 = vector.load %arg2[%c0_1, %c0_2] : memref<64x128xbf16, #tpu.memory_space<vmem>>, vector<64x128xbf16>
    %cst = arith.constant dense<0.000000e+00> : vector<8x128xf32>
    %2 = tpu.matmul %0, %1, %cst {dimension_numbers = #tpu.dot_dimension_numbers<[1], [0], [0], [1], [0, 0, 1, 1], [], []>} : vector<8x64xbf16>, vector<64x128xbf16>, vector<8x128xf32> -> vector<8x128xf32>
    %c0_3 = arith.constant 0 : index
    %c0_4 = arith.constant 0 : index
    %3 = vector.load %arg3[%c0_3, %c0_4] : memref<1x128xf32, #tpu.memory_space<vmem>>, vector<1x128xf32>
    %4 = vector.broadcast %3 : vector<1x128xf32> to vector<8x128xf32>
    %5 = arith.addf %2, %4 : vector<8x128xf32>
    %cst_5 = arith.constant 0.000000e+00 : f32
    %6 = vector.broadcast %cst_5 : f32 to vector<8x128xf32>
    %7 = arith.maximumf %5, %6 : vector<8x128xf32>
    %8 = arith.truncf %7 : vector<8x128xf32> to vector<8x128xbf16>
    %c0_6 = arith.constant 0 : index
    %c0_7 = arith.constant 0 : index
    %9 = vector.load %arg4[%c0_6, %c0_7] : memref<128x128xbf16, #tpu.memory_space<vmem>>, vector<128x128xbf16>
    %cst_8 = arith.constant dense<0.000000e+00> : vector<8x128xf32>
    %10 = tpu.matmul %8, %9, %cst_8 {dimension_numbers = #tpu.dot_dimension_numbers<[1], [0], [0], [1], [0, 0, 1, 1], [], []>} : vector<8x128xbf16>, vector<128x128xbf16>, vector<8x128xf32> -> vector<8x128xf32>
    %c0_9 = arith.constant 0 : index
    %c0_10 = arith.constant 0 : index
    %11 = vector.load %arg5[%c0_9, %c0_10] : memref<1x128xf32, #tpu.memory_space<vmem>>, vector<1x128xf32>
    %12 = vector.broadcast %11 : vector<1x128xf32> to vector<8x128xf32>
    %13 = arith.addf %10, %12 : vector<8x128xf32>
    %cst_11 = arith.constant 0.000000e+00 : f32
    %14 = vector.broadcast %cst_11 : f32 to vector<8x128xf32>
    %15 = arith.maximumf %13, %14 : vector<8x128xf32>
    %16 = arith.truncf %15 : vector<8x128xf32> to vector<8x128xbf16>
    %c0_12 = arith.constant 0 : index
    %c0_13 = arith.constant 0 : index
    %17 = vector.load %arg6[%c0_12, %c0_13] : memref<128x128xbf16, #tpu.memory_space<vmem>>, vector<128x128xbf16>
    %cst_14 = arith.constant dense<0.000000e+00> : vector<8x128xf32>
    %18 = tpu.matmul %16, %17, %cst_14 {dimension_numbers = #tpu.dot_dimension_numbers<[1], [0], [0], [1], [0, 0, 1, 1], [], []>} : vector<8x128xbf16>, vector<128x128xbf16>, vector<8x128xf32> -> vector<8x128xf32>
    %c0_15 = arith.constant 0 : index
    %c0_16 = arith.constant 0 : index
    %19 = vector.load %arg7[%c0_15, %c0_16] : memref<1x128xf32, #tpu.memory_space<vmem>>, vector<1x128xf32>
    %20 = vector.broadcast %19 : vector<1x128xf32> to vector<8x128xf32>
    %21 = arith.addf %18, %20 : vector<8x128xf32>
    %cst_17 = arith.constant dense<0xFF800000> : vector<8xf32>
    %22 = vector.multi_reduction <maximumf>, %21, %cst_17 [1] : vector<8x128xf32> to vector<8xf32>
    %23 = vector.shape_cast %22 : vector<8xf32> to vector<8x1xf32>
    %24 = vector.broadcast %23 : vector<8x1xf32> to vector<8x128xf32>
    %25 = arith.subf %21, %24 : vector<8x128xf32>
    %26 = math.exp %25 : vector<8x128xf32>
    %cst_18 = arith.constant dense<0.000000e+00> : vector<8xf32>
    %27 = vector.multi_reduction <add>, %26, %cst_18 [1] : vector<8x128xf32> to vector<8xf32>
    %28 = vector.shape_cast %27 : vector<8xf32> to vector<8x1xf32>
    %29 = math.log %28 : vector<8x1xf32>
    %30 = vector.broadcast %29 : vector<8x1xf32> to vector<8x128xf32>
    %31 = arith.subf %25, %30 : vector<8x128xf32>
    %c0_19 = arith.constant 0 : index
    %c0_20 = arith.constant 0 : index
    %32 = vector.load %arg8[%c0_19, %c0_20] : memref<8x128xf32, #tpu.memory_space<vmem>>, vector<8x128xf32>
    tpu.vector_store %arg8[%c0_19, %c0_20], %31 {strides = array<i32>} : memref<8x128xf32, #tpu.memory_space<vmem>>, vector<8x128xf32>,
    return
  }
  func.func @transform_0(%arg0: i32) -> (i32, i32) {
    %c0_i32 = arith.constant 0 : i32
    %c0_i32_0 = arith.constant 0 : i32
    return %arg0, %c0_i32 : i32, i32
  }
  func.func @transform_1(%arg0: i32) -> (i32, i32) {
    %c0_i32 = arith.constant 0 : i32
    %c0_i32_0 = arith.constant 0 : i32
    %c0_i32_1 = arith.constant 0 : i32
    return %c0_i32, %c0_i32_0 : i32, i32
  }
  func.func @transform_2(%arg0: i32) -> (i32, i32) {
    %c0_i32 = arith.constant 0 : i32
    %c0_i32_0 = arith.constant 0 : i32
    %c0_i32_1 = arith.constant 0 : i32
    return %c0_i32, %c0_i32_0 : i32, i32
  }
  func.func @transform_3(%arg0: i32) -> (i32, i32) {
    %c0_i32 = arith.constant 0 : i32
    %c0_i32_0 = arith.constant 0 : i32
    %c0_i32_1 = arith.constant 0 : i32
    return %c0_i32, %c0_i32_0 : i32, i32
  }
  func.func @transform_4(%arg0: i32) -> (i32, i32) {
    %c0_i32 = arith.constant 0 : i32
    %c0_i32_0 = arith.constant 0 : i32
    %c0_i32_1 = arith.constant 0 : i32
    return %c0_i32, %c0_i32_0 : i32, i32
  }
  func.func @transform_5(%arg0: i32) -> (i32, i32) {
    %c0_i32 = arith.constant 0 : i32
    %c0_i32_0 = arith.constant 0 : i32
    %c0_i32_1 = arith.constant 0 : i32
    return %c0_i32, %c0_i32_0 : i32, i32
  }
  func.func @transform_6(%arg0: i32) -> (i32, i32) {
    %c0_i32 = arith.constant 0 : i32
    %c0_i32_0 = arith.constant 0 : i32
    %c0_i32_1 = arith.constant 0 : i32
    return %c0_i32, %c0_i32_0 : i32, i32
  }
  func.func @transform_7(%arg0: i32) -> (i32, i32) {
    %c0_i32 = arith.constant 0 : i32
    %c0_i32_0 = arith.constant 0 : i32
    return %arg0, %c0_i32 : i32, i32
  }
}

</mosaic_0001>

<bundles_post_ra>
// kernel: classifier_forward.1
= control target key start
LH: loop header
LB: loop body
LE: loop exit
PB: predicated region body
PF: predicated region fallthrough
CT: control target
= control target key end

     0   :  { %12 = vsyncpa [#allocation3], 0  ;;  %s740_s0 = inlined_call_operand.vmem [shape: bf16[8,64], index: 0, kind: input, shape index: {}]   ;;  %s741_s1 = inlined_call_operand.hbm [shape: bf16[64,128], index: 1, kind: input, shape index: {}]   ;;  %s742_s2 = inlined_call_operand.vmem [shape: f32[1,128], index: 2, kind: input, shape index: {}]   ;;  %s743_s3 = inlined_call_operand.vmem [shape: bf16[128,128], index: 3, kind: input, shape index: {}]   ;;  %s744_s4 = inlined_call_operand.vmem [shape: f32[1,128], index: 4, kind: input, shape index: {}]   ;;  %s745_s5 = inlined_call_operand.hbm [shape: bf16[128,128], index: 5, kind: input, shape index: {}]   ;;  %s746_s6 = inlined_call_operand.vmem [shape: f32[1,128], index: 6, kind: input, shape index: {}]   ;;  %s747_s7 = inlined_call_operand.hbm [shape: f32[8,128], index: 7, kind: output, shape index: {}]  }
   0x1   :  { %13 = vsyncpa [#allocation6], 0 }
   0x2   :  { %14 = vsyncpa [#allocation4], 0  ;;  %s595_s24 = smov [#allocation2]   ;;  %s523_s28 = scalar_lea.hbm %s741_s1, 512 }
   0x3   :  { %s22_s25 = sshll.u32 %s595_s24, 4  ;;  %p524_p0 = scmp.ne.s32.totalorder %s741_s1, %s523_s28  ;;  %s23_s25 = int_to_ptr.vmem [resolvable:$true] %s22_s25 }
   0x4   :  { %p527_p1 = scmp.lt.u32.totalorder %s523_s28, %s741_s1 }
   0x6   :  { %p529_p2 = pnand %p527_p1, %p524_p0 }
   0x8   :  { %532 = shalt.err (!%p529_p2)
}
   0x9   :  { %s533_s10 = scalar_lea.vmem %s23_s25, 512  ;;  %p538_p4 = scmp.lt.s32.totalorder %s23_s25, %s23_s25 }
   0xa   :  { %p534_p3 = scmp.ne.s32.totalorder %s23_s25, %s533_s10  ;;  %p539_p5 = scmp.lt.s32.totalorder %s533_s10, %s533_s10 }
   0xc   :  { %p540_p6 = por %p539_p5, %p538_p4 }
   0xe   :  { %p541_p7 = pnand %p540_p6, %p534_p3 }
  0x10   :  { %544 = shalt.err (!%p541_p7)
}
  0x11   :  { %s596_s11 = smov 64   ;;  %s597_s12 = smov 4  }
  0x12   :  { %28 = dma.hbm_to_vmem [thread:$0]  %s741_s1, 512, %s23_s25, [#allocation3], %s596_s11, %s596_s11, %s597_s12  }
  0x13   :  { %s598_s15 = smov [#allocation5]   ;;  %s545_s19 = scalar_lea.hbm %s745_s5, 1024 }
  0x14   :  { %s40_s16 = sshll.u32 %s598_s15, 4  ;;  %p546_p8 = scmp.ne.s32.totalorder %s745_s5, %s545_s19  ;;  %s41_s16 = int_to_ptr.vmem [resolvable:$true] %s40_s16 }
  0x15   :  { %p549_p9 = scmp.lt.u32.totalorder %s545_s19, %s745_s5 }
  0x17   :  { %p551_p10 = pnand %p549_p9, %p546_p8 }
  0x19   :  { %554 = shalt.err (!%p551_p10)
}
  0x1a   :  { %s555_s24 = scalar_lea.vmem %s41_s16, 1024  ;;  %p560_p12 = scmp.lt.s32.totalorder %s41_s16, %s41_s16 }
  0x1b   :  { %p556_p11 = scmp.ne.s32.totalorder %s41_s16, %s555_s24  ;;  %p561_p13 = scmp.lt.s32.totalorder %s555_s24, %s555_s24 }
  0x1d   :  { %p562_p0 = por %p561_p13, %p560_p12 }
  0x1f   :  { %p563_p1 = pnand %p562_p0, %p556_p11 }
  0x21   :  { %566 = shalt.err (!%p563_p1)
}
  0x22   :  { %46 = dma.hbm_to_vmem [thread:$0]  %s745_s5, 1024, %s41_s16, [#allocation6], %s596_s11, %s596_s11, %s597_s12  }
  0x23   :  { %589 = dma.done.wait [#allocation3], 512  }
  0x24   :  { %590 = vsyncadd [#allocation3], 4294966784 }
  0x25   :  { %591 = dma.done.wait [#allocation6], 1024  }
  0x26   :  { %592 = vsyncadd [#allocation6], 4294966272  ;;  %v599_v0 = vmov 0.0   ;;  %vm600_vm0 = vmmov 0   ;;  %v499_v1 = vld [vmem:[#allocation2] sm:$0xff]   ;;  %v500_v2 = vld [vmem:[#allocation2 + $0x8] sm:$0xff]  }
  0x27   :  { %440 = vmatprep.subr.bf16.mxu0 %v599_v0  ;;  %448 = vmatprep.mubr.msk.bf16.mxu0 %vm600_vm0, %v599_v0  ;;  %v503_v3 = vld [vmem:[%s743_s3] sm:$0xff]   ;;  %v501_v4 = vld [vmem:[#allocation2 + $0x10] sm:$0xff]   ;;  %v504_v5 = vld [vmem:[%s743_s3 + $0x8] sm:$0xff]   ;;  %vm96_vm1 = vcmask 523264  }
  0x28   :  { %452 = vmatprep.subr.bf16.mxu1 %v599_v0  ;;  %468 = vmatprep.mubr.msk.bf16.mxu1 %vm600_vm0, %v599_v0  ;;  %v502_v6 = vld [vmem:[#allocation2 + $0x18] sm:$0xff]   ;;  %v505_v7 = vld [vmem:[%s743_s3 + $0x10] sm:$0xff]   ;;  %v56_v8 = vld [vmem:[%s740_s0] sm:$0xf] }
  0x29   :  { %441 = vmatpush3.bf16.msra.mxu0 %v499_v1  ;;  %453 = vmatpush3.bf16.msra.mxu1 %v503_v3  ;;  %v506_v9 = vld [vmem:[%s743_s3 + $0x18] sm:$0xff]   ;;  %v507_v10 = vld [vmem:[%s743_s3 + $0x20] sm:$0xff]   ;;  %v508_v11 = vld [vmem:[%s743_s3 + $0x28] sm:$0xff]  }
  0x2a   :  { %442 = vmatprep.subr.bf16.mxu0 %v599_v0  ;;  %454 = vmatprep.subr.bf16.mxu1 %v599_v0  ;;  %v509_v12 = vld [vmem:[%s743_s3 + $0x30] sm:$0xff]   ;;  %v510_v13 = vld [vmem:[%s743_s3 + $0x38] sm:$0xff]   ;;  %v511_v14 = vld [vmem:[#allocation5] sm:$0xff]  }
  0x2b   :  { %v512_v15 = vld [vmem:[#allocation5 + $0x8] sm:$0xff]   ;;  %v513_v16 = vld [vmem:[#allocation5 + $0x10] sm:$0xff]   ;;  %v514_v17 = vld [vmem:[#allocation5 + $0x18] sm:$0xff]  }
  0x2c   :  { %v515_v18 = vld [vmem:[#allocation5 + $0x20] sm:$0xff]   ;;  %v516_v19 = vld [vmem:[#allocation5 + $0x28] sm:$0xff]   ;;  %v517_v28 = vld [vmem:[#allocation5 + $0x30] sm:$0xff]  }
  0x2d   :  { %443 = vmatpush3.bf16.msra.mxu0 %v500_v2  ;;  %455 = vmatpush3.bf16.msra.mxu1 %v504_v5  ;;  %v393_v20 = vld [vmem:[%s742_s2] ss:$0 sm:$0xff]  ;;  %v518_v29 = vld [vmem:[#allocation5 + $0x38] sm:$0xff]  }
  0x2e   :  { %444 = vmatprep.subr.bf16.mxu0 %v599_v0  ;;  %456 = vmatprep.subr.bf16.mxu1 %v599_v0  ;;  %v399_v30 = vld [vmem:[%s744_s4] ss:$0 sm:$0xff]  ;;  %s601_s4 = smov [#allocation7]  }
  0x2f   :  { %v408_v38 = vld [vmem:[%s746_s6] ss:$0 sm:$0xff]  ;;  %s383_s23 = sshll.u32 %s601_s4, 4  ;;  %s384_s23 = int_to_ptr.vmem [resolvable:$true] %s383_s23 }
  0x30   :  { %s567_s6 = scalar_lea.vmem %s384_s23, 128  ;;  %p572_p3 = scmp.lt.s32.totalorder %s384_s23, %s384_s23 }
  0x31   :  { %445 = vmatpush3.bf16.msra.mxu0 %v501_v4  ;;  %457 = vmatpush3.bf16.msra.mxu1 %v505_v7  ;;  %p568_p2 = scmp.ne.s32.totalorder %s384_s23, %s567_s6  ;;  %p573_p4 = scmp.lt.s32.totalorder %s567_s6, %s567_s6 }
  0x32   :  { %446 = vmatprep.subr.bf16.mxu0 %v599_v0  ;;  %458 = vmatprep.subr.bf16.mxu1 %v599_v0 }
  0x33   :  { %p574_p5 = por %p573_p4, %p572_p3 }
  0x35   :  { %447 = vmatpush3.bf16.msra.mxu0 %v502_v6  ;;  %459 = vmatpush3.bf16.msra.mxu1 %v506_v9  ;;  %p575_p6 = pnand %p574_p5, %p568_p2 }
  0x36   :  { %472 = vmatprep.subr.bf16.mxu0 %v599_v0  ;;  %460 = vmatprep.subr.bf16.mxu1 %v599_v0 }
  0x38   :  { %449 = vmatmul.mubr.msk.bf16.vlgmr.msra.gmra.mrb[0].mxu0 %vm96_vm1, %v56_v8 }
  0x39   :  { %488 = vmatprep.mubr.msk.bf16.mxu0 %vm600_vm0, %v599_v0  ;;  %461 = vmatpush3.bf16.msra.mxu1 %v507_v10 }
  0x3a   :  { %462 = vmatprep.subr.bf16.mxu1 %v599_v0  ;;  %473 = vmatpush3.bf16.msra.mxu0 %v511_v14 }
  0x3b   :  { %474 = vmatprep.subr.bf16.mxu0 %v599_v0 }
  0x3d   :  { %463 = vmatpush3.bf16.msra.mxu1 %v508_v11 }
  0x3e   :  { %464 = vmatprep.subr.bf16.mxu1 %v599_v0  ;;  %475 = vmatpush3.bf16.msra.mxu0 %v512_v15 }
  0x3f   :  { %476 = vmatprep.subr.bf16.mxu0 %v599_v0 }
  0x41   :  { %465 = vmatpush3.bf16.msra.mxu1 %v509_v12 }
  0x42   :  { %466 = vmatprep.subr.bf16.mxu1 %v599_v0  ;;  %477 = vmatpush3.bf16.msra.mxu0 %v513_v16 }
  0x43   :  { %478 = vmatprep.subr.bf16.mxu0 %v599_v0 }
  0x45   :  { %467 = vmatpush3.bf16.msra.mxu1 %v510_v13 }
  0x46   :  { %479 = vmatpush3.bf16.msra.mxu0 %v514_v17 }
  0x47   :  { %480 = vmatprep.subr.bf16.mxu0 %v599_v0 }
  0x4a   :  { %481 = vmatpush3.bf16.msra.mxu0 %v515_v18 }
  0x4b   :  { %482 = vmatprep.subr.bf16.mxu0 %v599_v0 }
  0x4e   :  { %483 = vmatpush3.bf16.msra.mxu0 %v516_v19 }
  0x4f   :  { %484 = vmatprep.subr.bf16.mxu0 %v599_v0 }
  0x52   :  { %485 = vmatpush3.bf16.msra.mxu0 %v517_v28 }
  0x53   :  { %486 = vmatprep.subr.bf16.mxu0 %v599_v0 }
  0x56   :  { %487 = vmatpush3.bf16.msra.mxu0 %v518_v29 }
 0x10b   :  { %v134_v21 = vpop.f32.mrb[0].mxu0 }
 0x10c   :  { %v135_v22 = vadd.f32 %v393_v20, %v134_v21  ;;  %v450_v23 = vpop.f32.mrb[1].mxu0 }
 0x10d   :  { %v137_v24 = vpop.f32.mrb[2].mxu0 }
 0x10e   :  { %v140_v25 = vmax.f32 %v135_v22, 0.0  ;;  %v451_v26 = vpop.f32.mrb[3].mxu0 }
 0x110   :  { %v141_v27 = vpack.c.bf16 %v140_v25, %v140_v25 }
 0x112   :  { %469 = vmatmul.mubr.bf16.vlgmr.msra.gmra.mrb[0].mxu1 %v141_v27 }
 0x1e5   :  { %v247_v31 = vpop.f32.mrb[0].mxu1 }
 0x1e6   :  { %v248_v32 = vadd.f32 %v399_v30, %v247_v31  ;;  %v470_v33 = vpop.f32.mrb[1].mxu1 }
 0x1e7   :  { %v250_v34 = vpop.f32.mrb[2].mxu1 }
 0x1e8   :  { %v253_v35 = vmax.f32 %v248_v32, 0.0  ;;  %v471_v36 = vpop.f32.mrb[3].mxu1 }
 0x1ea   :  { %v254_v37 = vpack.c.bf16 %v253_v35, %v253_v35 }
 0x1ec   :  { %489 = vmatmul.mubr.bf16.vlgmr.msra.gmra.mrb[4].mxu0 %v254_v37 }
 0x2bf   :  { %v360_v39 = vpop.f32.mrb[4].mxu0 }
 0x2c0   :  { %v361_v40 = vadd.f32 %v408_v38, %v360_v39  ;;  %v490_v41 = vpop.f32.mrb[5].mxu0 }
 0x2c1   :  { %v363_v42 = vpop.f32.mrb[6].mxu0 }
 0x2c2   :  { %366 = vmax.xlane.f32.xlu0 %v361_v40  ;;  %v491_v43 = vpop.f32.mrb[7].mxu0 }
 0x34f   :  { %v367_v44 = vpop.xlane.xlu0 %366 }
 0x350   :  { %v368_v45 = vsub.f32 %v361_v40, %v367_v44 }
 0x352   :  { %v369_v46 = vmul.f32 1.442695, %v368_v45 }
 0x354   :  { %519 = vpow2.f32 %v369_v46 }
 0x35e   :  { %v520_v47 = vpop.eup %519 }
 0x35f   :  { %371 = vadd.xlane.f32.xlu0 %v520_v47 }
 0x3ec   :  { %v372_v48 = vpop.xlane.xlu0 %371 }
 0x3ed   :  { %521 = vlog2.f32 %v372_v48 }
 0x3f7   :  { %v522_v49 = vpop.eup %521 }
 0x3f8   :  { %v374_v50 = vmul.f32 0.6931472, %v522_v49 }
 0x3fa   :  { %v375_v51 = vsub.f32 %v368_v45, %v374_v50 }
 0x3fc   :  { %376 = vst [vmem:[#allocation7] sm:$0xff] %v375_v51 }
 0x3fd   :  { %578 = shalt.err (!%p575_p6)
}
 0x3fe   :  { %s579_s25 = scalar_lea.hbm %s747_s7, 128 }
 0x3ff   :  { %p580_p7 = scmp.ne.s32.totalorder %s747_s7, %s579_s25  ;;  %p583_p8 = scmp.lt.u32.totalorder %s579_s25, %s747_s7 }
 0x401   :  { %p585_p9 = pnand %p583_p8, %p580_p7 }
 0x403   :  { %588 = shalt.err (!%p585_p9)
}
 0x404   :  { %386 = dma.vmem_to_hbm [thread:$0]  %s384_s23, 128, %s747_s7, [#allocation4]  }
 0x405   :  { %593 = dma.done.wait [#allocation4], 128  }
 0x406   :  { %594 = vsyncadd [#allocation4], 4294967168 }
 0x407   :  { %390 = vsyncpa [#allocation3], 1 }
 0x408   :  { %391 = vsyncpa [#allocation6], 1 }
 0x409   :  { %392 = vsyncpa [#allocation4], 1 }

</bundles_post_ra>
